<compile_context>
chip_gen: v6e
topology: v6e:2x2x1
jax: 0.10.0
libtpu: 0.0.40
codegen_flags: <defaults>
</compile_context>

<pallas_src>
import functools

import jax
import jax.numpy as jnp
from jax.experimental import pallas as pl
from jax.experimental.pallas import tpu as pltpu


def _round_up(x, m):
    return (x + m - 1) // m * m


def dqn_kernel(x_ref, w1_ref, bcat_ref, w2_ref, o_ref, *, h1p):
    # fc1: (TILE_B, IN) @ (IN, H1P) -> fp32, + b1, ReLU (VPU)
    h = jnp.dot(x_ref[...], w1_ref[...], preferred_element_type=jnp.float32)
    h = h + bcat_ref[:, :h1p]                    # broadcast (1, H1P) over batch
    h = jnp.maximum(h, 0.0)
    # out: (TILE_B, H1P) @ (H1P, OUTP) -> fp32, + b2
    y = jnp.dot(h.astype(w2_ref.dtype), w2_ref[...],
                preferred_element_type=jnp.float32)
    y = y + bcat_ref[:, h1p:]                    # broadcast (1, OUTP) over batch
    o_ref[...] = y.astype(o_ref.dtype)


def dqn_forward(x, w1, b1, w2, b2, *, tile_b=512):
    """x: (B, in_states); w1: (in_states, h1); b1: (h1,); w2: (h1, out); b2: (out,).

    Weights are stored as (in_features, out_features), i.e. the transpose of
    PyTorch nn.Linear's (out, in), so the kernel does plain x @ W + b.
    """
    B, in_states = x.shape
    h1 = w1.shape[1]
    out_actions = w2.shape[1]
    out_dtype = x.dtype

    # Lane-dense padding (multiples of 128) for hidden / output widths.
    h1p = _round_up(h1, 128)
    outp = _round_up(out_actions, 128)

    # Batch tile: multiple of 16 sublanes (covers bf16 packing), capped at tile_b.
    tile_b_eff = min(tile_b, _round_up(B, 16))
    bp = _round_up(B, tile_b_eff)

    # Pad + cast. Zero padding is exact: padded hidden cols give ReLU(0)=0 and the
    # matching w2 rows are zero; padded output cols are sliced off below.
    xp = jnp.zeros((bp, in_states), jnp.bfloat16).at[:B, :].set(
        x.astype(jnp.bfloat16))
    w1p = jnp.zeros((in_states, h1p), jnp.bfloat16).at[:, :h1].set(
        w1.astype(jnp.bfloat16))
    w2p = jnp.zeros((h1p, outp), jnp.bfloat16).at[:h1, :out_actions].set(
        w2.astype(jnp.bfloat16))
    bcat = jnp.zeros((1, h1p + outp), jnp.float32)
    bcat = bcat.at[0, :h1].set(b1.astype(jnp.float32))
    bcat = bcat.at[0, h1p:h1p + out_actions].set(b2.astype(jnp.float32))

    grid = (bp // tile_b_eff,)

    yp = pl.pallas_call(
        functools.partial(dqn_kernel, h1p=h1p),
        out_shape=jax.ShapeDtypeStruct((bp, outp), jnp.float32),
        grid=grid,
        in_specs=[
            # Activations march along the batch grid axis.
            pl.BlockSpec((tile_b_eff, in_states), lambda i: (i, 0)),
            # Weights / biases: constant index_map -> resident in VMEM across steps.
            pl.BlockSpec((in_states, h1p), lambda i: (0, 0)),
            pl.BlockSpec((1, h1p + outp), lambda i: (0, 0)),
            pl.BlockSpec((h1p, outp), lambda i: (0, 0)),
        ],
        out_specs=pl.BlockSpec((tile_b_eff, outp), lambda i: (i, 0)),
        compiler_params=pltpu.CompilerParams(
            dimension_semantics=("parallel",),      # shards batch over 2 TCs on v7x
            vmem_limit_bytes=32 * 1024 * 1024,      # safe on v5e/v6e/v7x
        ),
    )(xp, w1p, bcat, w2p)

    return yp[:B, :out_actions].astype(out_dtype)


def init_dqn_params(key, in_states, h1_nodes, out_actions, dtype=jnp.float32):
    """Deterministic init mirroring nn.Linear's U(-1/sqrt(fan_in), 1/sqrt(fan_in))."""
    k1, k2, k3, k4 = jax.random.split(key, 4)
    bound1 = 1.0 / jnp.sqrt(in_states)
    bound2 = 1.0 / jnp.sqrt(h1_nodes)
    w1 = jax.random.uniform(k1, (in_states, h1_nodes), dtype, -bound1, bound1)
    b1 = jax.random.uniform(k2, (h1_nodes,), dtype, -bound1, bound1)
    w2 = jax.random.uniform(k3, (h1_nodes, out_actions), dtype, -bound2, bound2)
    b2 = jax.random.uniform(k4, (out_actions,), dtype, -bound2, bound2)
    return w1, b1, w2, b2


if __name__ == "__main__":
    # Small shapes consistent with the module: DQN(in_states=16, h1_nodes=32, out_actions=4)
    batch, in_states, h1_nodes, out_actions = 4, 16, 32, 4

    key = jax.random.PRNGKey(0)
    kx, kp = jax.random.split(key)
    x = jax.random.normal(kx, (batch, in_states), jnp.float32)
    w1, b1, w2, b2 = init_dqn_params(kp, in_states, h1_nodes, out_actions)

    y = dqn_forward(x, w1, b1, w2, b2)
    y = jax.block_until_ready(y)
    assert y.shape == (batch, out_actions)

    # Reference 1: same math with the same bf16-cast operands (tight tolerance).
    xb = x.astype(jnp.bfloat16).astype(jnp.float32)
    w1b = w1.astype(jnp.bfloat16).astype(jnp.float32)
    w2b = w2.astype(jnp.bfloat16).astype(jnp.float32)
    y_ref_bf16 = jnp.maximum(xb @ w1b + b1, 0.0) @ w2b + b2
    assert jnp.allclose(y, y_ref_bf16, atol=1e-3, rtol=1e-3)

    # Reference 2: full fp32 PyTorch-equivalent forward (bf16 quantization tolerance).
    y_ref_f32 = jnp.maximum(x @ w1 + b1, 0.0) @ w2 + b2
    assert jnp.allclose(y, y_ref_f32, atol=5e-2, rtol=5e-2)

    print("KERNEL_OK")
</pallas_src>

<mosaic_0001>
module attributes {stable_mosaic.version = 11 : i64} {
  func.func @dqn_kernel(%arg0: i32, %arg1: memref<16x16xbf16, #tpu.memory_space<vmem>>, %arg2: memref<16x128xbf16, #tpu.memory_space<vmem>>, %arg3: memref<1x256xf32, #tpu.memory_space<vmem>>, %arg4: memref<128x128xbf16, #tpu.memory_space<vmem>>, %arg5: memref<16x128xf32, #tpu.memory_space<vmem>>) attributes {dimension_semantics = [#tpu.dimension_semantics<parallel>], iteration_bounds = array<i64: 1>, scalar_prefetch = 0 : i64, scratch_operands = 0 : i64, tpu.core_type = #tpu.core_type<tc>, window_params = [{transform_indices = @transform_0, window_bounds = array<i64: 16, 16>}, {pipeline_mode = #tpu.pipeline_mode<synchronous>, transform_indices = @transform_1, window_bounds = array<i64: 16, 128>}, {pipeline_mode = #tpu.pipeline_mode<synchronous>, transform_indices = @transform_2, window_bounds = array<i64: 1, 256>}, {pipeline_mode = #tpu.pipeline_mode<synchronous>, transform_indices = @transform_3, window_bounds = array<i64: 128, 128>}, {transform_indices = @transform_4, window_bounds = array<i64: 16, 128>}]} {
    %c0 = arith.constant 0 : index
    %c0_0 = arith.constant 0 : index
    %0 = vector.load %arg1[%c0, %c0_0] : memref<16x16xbf16, #tpu.memory_space<vmem>>, vector<16x16xbf16>
    %c0_1 = arith.constant 0 : index
    %c0_2 = arith.constant 0 : index
    %1 = vector.load %arg2[%c0_1, %c0_2] : memref<16x128xbf16, #tpu.memory_space<vmem>>, vector<16x128xbf16>
    %cst = arith.constant dense<0.000000e+00> : vector<16x128xf32>
    %2 = tpu.matmul %0, %1, %cst {dimension_numbers = #tpu.dot_dimension_numbers<[1], [0], [0], [1], [0, 0, 1, 1], [], []>} : vector<16x16xbf16>, vector<16x128xbf16>, vector<16x128xf32> -> vector<16x128xf32>
    %c0_3 = arith.constant 0 : index
    %c0_4 = arith.constant 0 : index
    %3 = vector.load %arg3[%c0_3, %c0_4] : memref<1x256xf32, #tpu.memory_space<vmem>>, vector<1x128xf32>
    %4 = vector.broadcast %3 : vector<1x128xf32> to vector<16x128xf32>
    %5 = arith.addf %2, %4 : vector<16x128xf32>
    %cst_5 = arith.constant 0.000000e+00 : f32
    %6 = vector.broadcast %cst_5 : f32 to vector<16x128xf32>
    %7 = arith.maximumf %5, %6 : vector<16x128xf32>
    %8 = arith.truncf %7 : vector<16x128xf32> to vector<16x128xbf16>
    %c0_6 = arith.constant 0 : index
    %c0_7 = arith.constant 0 : index
    %9 = vector.load %arg4[%c0_6, %c0_7] : memref<128x128xbf16, #tpu.memory_space<vmem>>, vector<128x128xbf16>
    %cst_8 = arith.constant dense<0.000000e+00> : vector<16x128xf32>
    %10 = tpu.matmul %8, %9, %cst_8 {dimension_numbers = #tpu.dot_dimension_numbers<[1], [0], [0], [1], [0, 0, 1, 1], [], []>} : vector<16x128xbf16>, vector<128x128xbf16>, vector<16x128xf32> -> vector<16x128xf32>
    %c0_9 = arith.constant 0 : index
    %c128 = arith.constant 128 : index
    %11 = vector.load %arg3[%c0_9, %c128] : memref<1x256xf32, #tpu.memory_space<vmem>>, vector<1x128xf32>
    %12 = vector.broadcast %11 : vector<1x128xf32> to vector<16x128xf32>
    %13 = arith.addf %10, %12 : vector<16x128xf32>
    %c0_10 = arith.constant 0 : index
    %c0_11 = arith.constant 0 : index
    %14 = vector.load %arg5[%c0_10, %c0_11] : memref<16x128xf32, #tpu.memory_space<vmem>>, vector<16x128xf32>
    tpu.vector_store %arg5[%c0_10, %c0_11], %13 {strides = array<i32>} : memref<16x128xf32, #tpu.memory_space<vmem>>, vector<16x128xf32>,
    return
  }
  func.func @transform_0(%arg0: i32) -> (i32, i32) {
    %c0_i32 = arith.constant 0 : i32
    %c0_i32_0 = arith.constant 0 : i32
    return %arg0, %c0_i32 : i32, i32
  }
  func.func @transform_1(%arg0: i32) -> (i32, i32) {
    %c0_i32 = arith.constant 0 : i32
    %c0_i32_0 = arith.constant 0 : i32
    %c0_i32_1 = arith.constant 0 : i32
    return %c0_i32, %c0_i32_0 : i32, i32
  }
  func.func @transform_2(%arg0: i32) -> (i32, i32) {
    %c0_i32 = arith.constant 0 : i32
    %c0_i32_0 = arith.constant 0 : i32
    %c0_i32_1 = arith.constant 0 : i32
    return %c0_i32, %c0_i32_0 : i32, i32
  }
  func.func @transform_3(%arg0: i32) -> (i32, i32) {
    %c0_i32 = arith.constant 0 : i32
    %c0_i32_0 = arith.constant 0 : i32
    %c0_i32_1 = arith.constant 0 : i32
    return %c0_i32, %c0_i32_0 : i32, i32
  }
  func.func @transform_4(%arg0: i32) -> (i32, i32) {
    %c0_i32 = arith.constant 0 : i32
    %c0_i32_0 = arith.constant 0 : i32
    return %arg0, %c0_i32 : i32, i32
  }
}

</mosaic_0001>

<bundles_post_ra>
// kernel: tpu_custom_call.1
= control target key start
LH: loop header
LB: loop body
LE: loop exit
PB: predicated region body
PF: predicated region fallthrough
CT: control target
= control target key end

     0   :  { %9 = vsyncpa [#allocation3], 0  ;;  %s471_s0 = inlined_call_operand.hbm [shape: bf16[16,16], index: 0, kind: input, shape index: {}]   ;;  %s472_s1 = inlined_call_operand.hbm [shape: bf16[16,128], index: 1, kind: input, shape index: {}]   ;;  %s473_s2 = inlined_call_operand.vmem [shape: f32[1,256], index: 2, kind: input, shape index: {}]   ;;  %s474_s3 = inlined_call_operand.hbm [shape: bf16[128,128], index: 3, kind: input, shape index: {}]   ;;  %s475_s4 = inlined_call_operand.hbm [shape: f32[16,128], index: 4, kind: output, shape index: {}]  }
   0x1   :  { %10 = vsyncpa [#allocation6], 0 }
   0x2   :  { %11 = vsyncpa [#allocation4], 0  ;;  %s418_s15 = smov [#allocation5]   ;;  %s419_s17 = smov [#allocation2]  }
   0x3   :  { %s29_s16 = sshll.u32 %s418_s15, 4  ;;  %s17_s18 = sshll.u32 %s419_s17, 4  ;;  %s30_s16 = int_to_ptr.vmem [resolvable:$true] %s29_s16  ;;  %s18_s18 = int_to_ptr.vmem [resolvable:$true] %s17_s18 }
   0x4   :  { %s340_s19 = scalar_lea.vmem %s30_s16, 128  ;;  %p345_p1 = scmp.lt.s32.totalorder %s30_s16, %s30_s16 }
   0x5   :  { %p341_p0 = scmp.ne.s32.totalorder %s30_s16, %s340_s19  ;;  %p346_p2 = scmp.lt.s32.totalorder %s340_s19, %s340_s19 }
   0x7   :  { %p347_p3 = por %p346_p2, %p345_p1 }
   0x9   :  { %p348_p4 = pnand %p347_p3, %p341_p0 }
   0xb   :  { %351 = shalt.err (!%p348_p4)
}
   0xc   :  { %s420_s20 = smov 64   ;;  %s421_s21 = smov 4  }
   0xd   :  { %35 = dma.hbm_to_vmem [thread:$0]  %s472_s1, 128, %s30_s16, [#allocation6], %s420_s20, %s420_s20, %s421_s21  }
   0xe   :  { %s360_s24 = scalar_lea.vmem %s18_s18, 128  ;;  %p365_p6 = scmp.lt.s32.totalorder %s18_s18, %s18_s18 }
   0xf   :  { %p361_p5 = scmp.ne.s32.totalorder %s18_s18, %s360_s24  ;;  %p366_p7 = scmp.lt.s32.totalorder %s360_s24, %s360_s24 }
  0x11   :  { %p367_p8 = por %p366_p7, %p365_p6 }
  0x13   :  { %p368_p9 = pnand %p367_p8, %p361_p5 }
  0x15   :  { %371 = shalt.err (!%p368_p9)
}
  0x16   :  { %23 = dma.hbm_to_vmem [thread:$0]  %s471_s0, 128, %s18_s18, [#allocation3], %s420_s20, %s420_s20, %s421_s21  }
  0x17   :  { %s422_s27 = smov [#allocation7]  }
  0x18   :  { %s43_s28 = sshll.u32 %s422_s27, 4  ;;  %s44_s28 = int_to_ptr.vmem [resolvable:$true] %s43_s28 }
  0x19   :  { %s380_s29 = scalar_lea.vmem %s44_s28, 1024  ;;  %p385_p11 = scmp.lt.s32.totalorder %s44_s28, %s44_s28 }
  0x1a   :  { %p381_p10 = scmp.ne.s32.totalorder %s44_s28, %s380_s29  ;;  %p386_p12 = scmp.lt.s32.totalorder %s380_s29, %s380_s29 }
  0x1c   :  { %p387_p13 = por %p386_p12, %p385_p11 }
  0x1e   :  { %p388_p0 = pnand %p387_p13, %p381_p10 }
  0x20   :  { %391 = shalt.err (!%p388_p0)
}
  0x21   :  { %49 = dma.hbm_to_vmem [thread:$0]  %s474_s3, 1024, %s44_s28, [#allocation6], %s420_s20, %s420_s20, %s421_s21  }
  0x22   :  { %412 = dma.done.wait [#allocation3], 128  }
  0x23   :  { %413 = vsyncadd [#allocation3], 4294967168 }
  0x24   :  { %414 = dma.done.wait [#allocation6], 1152  }
  0x25   :  { %415 = vsyncadd [#allocation6], 4294966144  ;;  %v423_v0 = vmov 0.0   ;;  %vm424_vm0 = vmmov 0   ;;  %v322_v1 = vld [vmem:[#allocation5] sm:$0xff]   ;;  %v323_v2 = vld [vmem:[#allocation2] sm:$0xff]  }
  0x26   :  { %286 = vmatprep.subr.bf16.mxu0 %v423_v0  ;;  %288 = vmatprep.mubr.msk.bf16.mxu0 %vm424_vm0, %v423_v0  ;;  %vm82_vm1 = vcmask 130048   ;;  %v324_v3 = vld [vmem:[#allocation7 + $0x38] sm:$0xff]   ;;  %v325_v4 = vld [vmem:[#allocation7 + $0x30] sm:$0xff]   ;;  %v326_v5 = vld [vmem:[#allocation7 + $0x28] sm:$0xff]   ;;  %s425_s7 = smov [#allocation8]  }
  0x27   :  { %292 = vmatprep.subr.bf16.mxu1 %v423_v0  ;;  %308 = vmatprep.mubr.msk.bf16.mxu1 %vm424_vm0, %v423_v0  ;;  %v327_v6 = vld [vmem:[#allocation7 + $0x20] sm:$0xff]   ;;  %v328_v7 = vld [vmem:[#allocation7 + $0x18] sm:$0xff]   ;;  %v329_v8 = vld [vmem:[#allocation7 + $0x10] sm:$0xff]   ;;  %s249_s8 = sshll.u32 %s425_s7, 4  ;;  %s250_s8 = int_to_ptr.vmem [resolvable:$true] %s249_s8 }
  0x28   :  { %287 = vmatpush3.bf16.msra.mxu0 %v322_v1  ;;  %293 = vmatpush3.bf16.msra.mxu1 %v324_v3  ;;  %v330_v9 = vld [vmem:[#allocation7 + $0x8] sm:$0xff]   ;;  %v331_v10 = vld [vmem:[#allocation7] sm:$0xff]   ;;  %v262_v11 = vld [vmem:[%s473_s2] ss:$0 sm:$0xff]  ;;  %s392_s9 = scalar_lea.vmem %s250_s8, 256  ;;  %p397_p2 = scmp.lt.s32.totalorder %s250_s8, %s250_s8 }
  0x29   :  { %294 = vmatprep.subr.bf16.mxu1 %v423_v0  ;;  %v266_v21 = vld [vmem:[%s473_s2 + $0x1] ss:$0 sm:$0xff]  ;;  %p393_p1 = scmp.ne.s32.totalorder %s250_s8, %s392_s9  ;;  %p398_p3 = scmp.lt.s32.totalorder %s392_s9, %s392_s9 }
  0x2b   :  { %289 = vmatmul.mubr.msk.bf16.vlgmr.msra.gmra.mxu0 %vm82_vm1, %v323_v2  ;;  %p399_p4 = por %p398_p3, %p397_p2 }
  0x2c   :  { %295 = vmatpush3.bf16.msra.mxu1 %v325_v4 }
  0x2d   :  { %296 = vmatprep.subr.bf16.mxu1 %v423_v0  ;;  %p400_p5 = pnand %p399_p4, %p393_p1 }
  0x30   :  { %297 = vmatpush3.bf16.msra.mxu1 %v326_v5 }
  0x31   :  { %298 = vmatprep.subr.bf16.mxu1 %v423_v0 }
  0x34   :  { %299 = vmatpush3.bf16.msra.mxu1 %v327_v6 }
  0x35   :  { %300 = vmatprep.subr.bf16.mxu1 %v423_v0 }
  0x38   :  { %301 = vmatpush3.bf16.msra.mxu1 %v328_v7 }
  0x39   :  { %302 = vmatprep.subr.bf16.mxu1 %v423_v0 }
  0x3c   :  { %303 = vmatpush3.bf16.msra.mxu1 %v329_v8 }
  0x3d   :  { %304 = vmatprep.subr.bf16.mxu1 %v423_v0 }
  0x40   :  { %305 = vmatpush3.bf16.msra.mxu1 %v330_v9 }
  0x41   :  { %306 = vmatprep.subr.bf16.mxu1 %v423_v0 }
  0x44   :  { %307 = vmatpush3.bf16.msra.mxu1 %v331_v10 }
  0xeb   :  { %v120_v12 = vpop.f32.mrf.mxu0 }
  0xec   :  { %v121_v14 = vadd.f32 %v262_v11, %v120_v12 }
  0xed   :  { %v290_v13 = vpop.f32.mrf.mxu0 }
  0xee   :  { %v127_v18 = vmax.f32 %v121_v14, 0.0 }
  0xef   :  { %v123_v15 = vpop.f32.mrf.mxu0 }
  0xf0   :  { %v124_v16 = vadd.f32 %v262_v11, %v123_v15 }
  0xf1   :  { %v291_v17 = vpop.f32.mrf.mxu0 }
  0xf2   :  { %v128_v19 = vmax.f32 %v124_v16, 0.0 }
  0xf4   :  { %v129_v20 = vpack.c.bf16 %v128_v19, %v127_v18 }
  0xf6   :  { %309 = vmatmul.mubr.bf16.vlgmr.msra.gmra.mxu1 %v129_v20 }
 0x1b6   :  { %v235_v22 = vpop.f32.mrf.mxu1 }
 0x1b7   :  { %v236_v23 = vadd.f32 %v266_v21, %v235_v22 }
 0x1b8   :  { %v310_v24 = vpop.f32.mrf.mxu1 }
 0x1b9   :  { %242 = vst [vmem:[#allocation8] sm:$0xff] %v236_v23 }
 0x1ba   :  { %v238_v25 = vpop.f32.mrf.mxu1 }
 0x1bb   :  { %v239_v26 = vadd.f32 %v266_v21, %v238_v25 }
 0x1bc   :  { %v311_v27 = vpop.f32.mrf.mxu1 }
 0x1bd   :  { %243 = vst [vmem:[#allocation8 + $0x8] sm:$0xff] %v239_v26 }
 0x1be   :  { %403 = shalt.err (!%p400_p5)
}
 0x1bf   :  { %s426_s10 = smov 128   ;;  %s427_s2 = smov 8  }
 0x1c0   :  { %255 = dma.vmem_to_hbm [thread:$0]  %s250_s8, 256, %s475_s4, [#allocation4], %s426_s10, %s426_s10, %s427_s2  }
 0x1c1   :  { %416 = dma.done.wait [#allocation4], 256  }
 0x1c2   :  { %417 = vsyncadd [#allocation4], 4294967040 }
 0x1c3   :  { %259 = vsyncpa [#allocation3], 1 }
 0x1c4   :  { %260 = vsyncpa [#allocation6], 1 }
 0x1c5   :  { %261 = vsyncpa [#allocation4], 1 }

</bundles_post_ra>
